<compile_context>
chip_gen: v5e
topology: v5e:2x2
jax: 0.10.0
libtpu: 0.0.40
codegen_flags: <defaults>
</compile_context>

<pallas_src>
import functools

import jax
import jax.numpy as jnp
from jax import lax
from jax.experimental import pallas as pl
from jax.experimental.pallas import tpu as pltpu

LAYER_NORM_EPS = 1e-12


def _bert_embeddings_kernel(
    ids_ref,       # SMEM (N,)  int32 : flattened input_ids (scalar prefetch)
    wtab_ref,      # HBM  (V, H)      : word embedding table (memory_space=ANY)
    pos_ref,       # VMEM (ts, H)     : contiguous position-embedding rows
    ttab_ref,      # VMEM (T, H)      : token-type table (tiny, resident)
    tok_ref,       # VMEM (ts, 1) i32 : token-type ids of this tile
    gamma_ref,     # VMEM (1, H) f32
    beta_ref,      # VMEM (1, H) f32
    out_ref,       # VMEM (ts, H)     : activation dtype
    wbuf_ref,      # VMEM (2, ts, H)  : double-buffered gather landing buffer
    dma_sem,       # DMA semaphores (n_sem,)
    *, seq_len, seq_tile, n_sem):
    s = pl.program_id(0)            # sequence-tile index (outer, "parallel")
    b = pl.program_id(1)            # batch index         (inner, "arbitrary")
    n_b = pl.num_programs(1)
    slot = b % 2

    # One helper builds both the .start() and the .wait() descriptor so the
    # shapes / byte counts always stay in sync.
    def row_copy(row_id, r, buf_slot):
        return pltpu.make_async_copy(
            wtab_ref.at[pl.ds(row_id, 1)],
            wbuf_ref.at[buf_slot, pl.ds(r, 1)],
            dma_sem.at[r % n_sem])

    def issue_rows(bb, buf_slot):
        base = bb * seq_len + s * seq_tile
        @pl.loop(0, seq_tile)
        def _(r):
            # TODO(synk): dedupe repeated ids / special-case pad_token_id to skip DMAs.
            row_copy(ids_ref[base + r], r, buf_slot).start()

    def wait_rows(buf_slot):
        @pl.loop(0, seq_tile)
        def _(r):
            # Constant src row 0: only the (1, H) shape matters for the wait, and
            # no SMEM scalar load sits right after the .wait() (no sst->sld stall).
            row_copy(0, r, buf_slot).wait()

    # Prime the pipeline at the first batch step of this sequence tile.
    @pl.when(b == 0)
    def _():
        issue_rows(0, 0)

    # The current step's rows were issued one grid step ago (or just primed).
    wait_rows(slot)

    # Kick off the gather for the next batch step; it overlaps the LayerNorm
    # below and the pipelined output store.
    @pl.when(b + 1 < n_b)
    def _():
        issue_rows(b + 1, 1 - slot)

    word_emb = wbuf_ref[slot].astype(jnp.float32)      # (ts, H) f32
    pos_emb = pos_ref[...].astype(jnp.float32)         # (ts, H) f32

    # ---- token-type embedding: tiny vocab, pure VPU work ----------------------
    trows = ttab_ref[...].astype(jnp.float32)          # (T, H)
    tok = tok_ref[...]                                 # (ts, 1) int32
    if ttab_ref.shape[0] == 2:
        # BERT default T == 2: single FMA instead of compare/select chain.
        type_emb = trows[0:1, :] + tok.astype(jnp.float32) * (trows[1:2, :] - trows[0:1, :])
    else:
        type_emb = jnp.broadcast_to(trows[0:1, :], word_emb.shape)
        for t in range(1, ttab_ref.shape[0]):
            type_emb = jnp.where(tok == t, trows[t:t + 1, :], type_emb)

    x = word_emb + pos_emb + type_emb                  # (ts, H) f32

    # ---- LayerNorm over hidden dim (centered variance, all f32) ---------------
    mean = jnp.mean(x, axis=-1, keepdims=True)
    xc = x - mean
    var = jnp.mean(xc * xc, axis=-1, keepdims=True)
    out = xc * lax.rsqrt(var + LAYER_NORM_EPS) * gamma_ref[...] + beta_ref[...]

    # TODO(synk): nn.Dropout(p>0) in training mode would need pltpu.prng_*; eval mode is identity.
    out_ref[...] = out.astype(out_ref.dtype)


def bert_embeddings(input_ids, word_table, type_table, pos_table, gamma, beta,
                    token_type_ids=None, position_ids=None,
                    past_key_values_length=0, *,
                    seq_tile=None, n_sem=16, out_dtype=None):
    B, S = input_ids.shape
    V, H = word_table.shape
    T = type_table.shape[0]
    N = B * S
    table_dtype = word_table.dtype
    if out_dtype is None:
        out_dtype = table_dtype

    if token_type_ids is None:
        token_type_ids = jnp.zeros((B, S), jnp.int32)

    if position_ids is None:
        # Module default: registered arange buffer, offset by past_key_values_length.
        pos_slab = pos_table[past_key_values_length:past_key_values_length + S]
    else:
        # TODO(synk): per-batch-varying position_ids would need an in-kernel DMA
        # gather like the word table; the module's buffer is (1, P), rows identical.
        pos_slab = pos_table[jnp.asarray(position_ids).reshape(-1, S)[0]]
    pos_slab = pos_slab.astype(table_dtype)

    if seq_tile is None:
        # bf16 I/O -> larger tiles fit comfortably; f32 stays at 256 (v5e/v7x VMEM).
        cap = 512 if jnp.dtype(table_dtype).itemsize <= 2 else 256
        seq_tile = None
        for cand in range(min(S, cap), 0, -1):
            if S % cand == 0 and cand % 8 == 0:
                seq_tile = cand
                break
        if seq_tile is None:
            seq_tile = S
    assert S % seq_tile == 0, "seq_tile must divide the sequence length"
    assert seq_tile % 8 == 0 or seq_tile == N, (
        "tile rows must be a multiple of 8 (or span the whole flattened batch)")
    n_seq_tiles = S // seq_tile
    n_sem = max(1, min(n_sem, seq_tile))

    ids_flat = input_ids.reshape(N).astype(jnp.int32)
    tok_flat = token_type_ids.reshape(N, 1).astype(jnp.int32)
    gamma2 = gamma.reshape(1, H).astype(jnp.float32)
    beta2 = beta.reshape(1, H).astype(jnp.float32)

    kernel = functools.partial(_bert_embeddings_kernel,
                               seq_len=S, seq_tile=seq_tile, n_sem=n_sem)

    itemsize = jnp.dtype(table_dtype).itemsize
    vmem_bytes = seq_tile * H * (2 * jnp.dtype(out_dtype).itemsize
                                 + 4 * itemsize + 8 * 4) + (2 << 20)
    vmem_bytes = int(min(max(vmem_bytes, 16 << 20), 64 << 20))

    out = pl.pallas_call(
        kernel,
        out_shape=jax.ShapeDtypeStruct((N, H), out_dtype),
        grid_spec=pltpu.PrefetchScalarGridSpec(
            num_scalar_prefetch=1,
            grid=(n_seq_tiles, B),   # seq tiles outer, batch inner
            in_specs=[
                pl.BlockSpec(memory_space=pl.ANY),                        # word table stays in HBM
                pl.BlockSpec((seq_tile, H), lambda s, b, ids: (s, 0)),    # pos rows (reused across b)
                pl.BlockSpec((T, H), lambda s, b, ids: (0, 0)),           # token-type table (tiny)
                pl.BlockSpec((seq_tile, 1),
                             lambda s, b, ids: (b * n_seq_tiles + s, 0)),   # token-type ids
                pl.BlockSpec((1, H), lambda s, b, ids: (0, 0)),           # LayerNorm gamma
                pl.BlockSpec((1, H), lambda s, b, ids: (0, 0)),           # LayerNorm beta
            ],
            out_specs=pl.BlockSpec((seq_tile, H),
                                   lambda s, b, ids: (b * n_seq_tiles + s, 0)),
            scratch_shapes=[
                pltpu.VMEM((2, seq_tile, H), table_dtype),   # double-buffered gather buffer
                pltpu.SemaphoreType.DMA((n_sem,)),           # completion-count spreading
            ]),
        compiler_params=pltpu.CompilerParams(
            # Inner batch axis must run sequentially (cross-step DMA prefetch);
            # the outer sequence-tile axis still shards across TensorCores (v7x).
            dimension_semantics=("parallel", "arbitrary"),
            vmem_limit_bytes=vmem_bytes),
    )(ids_flat,
      word_table,
      pos_slab,
      type_table.astype(table_dtype),
      tok_flat, gamma2, beta2)

    return out.reshape(B, S, H)


def reference_embeddings(input_ids, token_type_ids, position_ids,
                         word_table, type_table, pos_table, gamma, beta):
    emb = (word_table[input_ids]
           + type_table[token_type_ids]
           + pos_table[position_ids])
    mean = jnp.mean(emb, axis=-1, keepdims=True)
    var = jnp.mean((emb - mean) ** 2, axis=-1, keepdims=True)
    normed = (emb - mean) * jax.lax.rsqrt(var + LAYER_NORM_EPS)
    return normed * gamma + beta


if __name__ == "__main__":
    # Small synthetic BERT config (hidden = 128 keeps the output lane-dense).
    vocab_size = 128
    hidden_size = 128
    max_position_embeddings = 64
    type_vocab_size = 2
    pad_token_id = 0
    B, S = 2, 16

    key = jax.random.PRNGKey(0)
    k_w, k_p, k_t, k_ids, k_tok = jax.random.split(key, 5)

    # BERT-style normal(0, 0.02) init; padding_idx row zeroed.
    word_table = 0.02 * jax.random.normal(k_w, (vocab_size, hidden_size), jnp.float32)
    word_table = word_table.at[pad_token_id].set(0.0)
    pos_table = 0.02 * jax.random.normal(k_p, (max_position_embeddings, hidden_size), jnp.float32)
    type_table = 0.02 * jax.random.normal(k_t, (type_vocab_size, hidden_size), jnp.float32)
    gamma = jnp.ones((hidden_size,), jnp.float32)
    beta = jnp.zeros((hidden_size,), jnp.float32)

    input_ids = jax.random.randint(k_ids, (B, S), 0, vocab_size, dtype=jnp.int32)
    input_ids = input_ids.at[:, -2:].set(pad_token_id)   # some padding, like real batches
    token_type_ids = jax.random.randint(k_tok, (B, S), 0, type_vocab_size, dtype=jnp.int32)
    position_ids = jnp.broadcast_to(jnp.arange(S, dtype=jnp.int32), (B, S))

    ref = reference_embeddings(input_ids, token_type_ids, position_ids,
                               word_table, type_table, pos_table, gamma, beta)

    # f32 path: must match the pure-JAX reference tightly.
    out_f32 = bert_embeddings(input_ids, word_table, type_table, pos_table, gamma, beta,
                              token_type_ids=token_type_ids)
    out_f32 = jax.block_until_ready(out_f32)
    assert out_f32.shape == (B, S, hidden_size)
    assert jnp.allclose(out_f32, ref, atol=1e-5, rtol=1e-5), \
        float(jnp.max(jnp.abs(out_f32 - ref)))

    # bf16 I/O path (native-dtype gather, bf16 output): loose tolerance.
    out_bf16 = bert_embeddings(input_ids,
                               word_table.astype(jnp.bfloat16),
                               type_table.astype(jnp.bfloat16),
                               pos_table.astype(jnp.bfloat16),
                               gamma, beta, token_type_ids=token_type_ids)
    out_bf16 = jax.block_until_ready(out_bf16)
    assert out_bf16.dtype == jnp.bfloat16
    assert jnp.allclose(out_bf16.astype(jnp.float32), ref, atol=8e-2), \
        float(jnp.max(jnp.abs(out_bf16.astype(jnp.float32) - ref)))

    print("KERNEL_OK")
</pallas_src>

<mosaic_0001>
module attributes {stable_mosaic.version = 11 : i64} {
  func.func @_bert_embeddings_kernel(%arg0: i32, %arg1: i32, %arg2: memref<32xi32, #tpu.memory_space<smem>>, %arg3: memref<128x128xf32, #tpu.memory_space<any>>, %arg4: memref<16x128xf32, #tpu.memory_space<vmem>>, %arg5: memref<2x128xf32, #tpu.memory_space<vmem>>, %arg6: memref<16x1xi32, #tpu.memory_space<vmem>>, %arg7: memref<1x128xf32, #tpu.memory_space<vmem>>, %arg8: memref<1x128xf32, #tpu.memory_space<vmem>>, %arg9: memref<16x128xf32, #tpu.memory_space<vmem>>, %arg10: memref<2x16x128xf32, #tpu.memory_space<vmem>>, %arg11: memref<16x!tpu.dma_semaphore, #tpu.memory_space<semaphore_mem>>) attributes {dimension_semantics = [#tpu.dimension_semantics<parallel>, #tpu.dimension_semantics<arbitrary>], iteration_bounds = array<i64: 1, 2>, scalar_prefetch = 1 : i64, scratch_operands = 2 : i64, tpu.core_type = #tpu.core_type<tc>, window_params = [{}, {transform_indices = @transform_1, window_bounds = array<i64: 16, 128>}, {pipeline_mode = #tpu.pipeline_mode<synchronous>, transform_indices = @transform_2, window_bounds = array<i64: 2, 128>}, {transform_indices = @transform_3, window_bounds = array<i64: 16, 1>}, {pipeline_mode = #tpu.pipeline_mode<synchronous>, transform_indices = @transform_4, window_bounds = array<i64: 1, 128>}, {pipeline_mode = #tpu.pipeline_mode<synchronous>, transform_indices = @transform_5, window_bounds = array<i64: 1, 128>}, {transform_indices = @transform_6, window_bounds = array<i64: 16, 128>}]} {
    %c2_i32 = arith.constant 2 : i32
    %c0_i32 = arith.constant 0 : i32
    %0 = arith.cmpi eq, %c2_i32, %c0_i32 : i32
    %c1_i32 = arith.constant 1 : i32
    %1 = arith.select %0, %c1_i32, %c2_i32 : i32
    %2 = arith.remsi %arg1, %1 : i32
    %c0_i32_0 = arith.constant 0 : i32
    %3 = arith.cmpi ne, %2, %c0_i32_0 : i32
    %c0_i32_1 = arith.constant 0 : i32
    %4 = arith.cmpi slt, %2, %c0_i32_1 : i32
    %c0_i32_2 = arith.constant 0 : i32
    %5 = arith.cmpi slt, %1, %c0_i32_2 : i32
    %6 = arith.xori %4, %5 : i1
    %7 = arith.andi %6, %3 : i1
    %8 = arith.addi %2, %1 : i32
    %9 = arith.select %7, %8, %2 : i32
    %c0_i32_3 = arith.constant 0 : i32
    %10 = arith.cmpi eq, %arg1, %c0_i32_3 : i32
    %11 = arith.extui %10 : i1 to i32
    %c0_i32_4 = arith.constant 0 : i32
    %12 = arith.cmpi ne, %11, %c0_i32_4 : i32
    scf.if %12 {
      %c16_i32_28 = arith.constant 16 : i32
      %59 = arith.muli %arg0, %c16_i32_28 : i32
      %c0_i32_29 = arith.constant 0 : i32
      %60 = arith.addi %c0_i32_29, %59 : i32
      %c0_i32_30 = arith.constant 0 : i32
      %c16_i32_31 = arith.constant 16 : i32
      %61 = arith.addi %c0_i32_30, %c16_i32_31 : i32
      %c1_i32_32 = arith.constant 1 : i32
      scf.for %arg12 = %c0_i32_30 to %61 step %c1_i32_32  : i32 {
        %c1_i32_34 = arith.constant 1 : i32
        %62 = arith.muli %arg12, %c1_i32_34 : i32
        %c0_i32_35 = arith.constant 0 : i32
        %63 = arith.addi %c0_i32_35, %62 : i32
        %64 = arith.addi %60, %63 : i32
        %65 = arith.index_cast %64 : i32 to index
        %66 = memref.load %arg2[%65] : memref<32xi32, #tpu.memory_space<smem>>
        %c16_i32_36 = arith.constant 16 : i32
        %c0_i32_37 = arith.constant 0 : i32
        %67 = arith.cmpi eq, %c16_i32_36, %c0_i32_37 : i32
        %c1_i32_38 = arith.constant 1 : i32
        %68 = arith.select %67, %c1_i32_38, %c16_i32_36 : i32
        %69 = arith.remsi %63, %68 : i32
        %c0_i32_39 = arith.constant 0 : i32
        %70 = arith.cmpi ne, %69, %c0_i32_39 : i32
        %c0_i32_40 = arith.constant 0 : i32
        %71 = arith.cmpi slt, %69, %c0_i32_40 : i32
        %c0_i32_41 = arith.constant 0 : i32
        %72 = arith.cmpi slt, %68, %c0_i32_41 : i32
        %73 = arith.xori %71, %72 : i1
        %74 = arith.andi %73, %70 : i1
        %75 = arith.addi %69, %68 : i32
        %76 = arith.select %74, %75, %69 : i32
        %c0_i32_42 = arith.constant 0 : i32
        %c0_i32_43 = arith.constant 0 : i32
        %77 = tpu.memref_slice %arg3[%66, %c0_i32_43] : memref<128x128xf32, #tpu.memory_space<any>> -> memref<1x128xf32, #tpu.memory_space<any>>
        %c0_i32_44 = arith.constant 0 : i32
        %78 = tpu.memref_slice %arg10[%c0_i32_42, %63, %c0_i32_44] : memref<2x16x128xf32, #tpu.memory_space<vmem>> -> memref<1x1x128xf32, #tpu.memory_space<vmem>>
        %79 = tpu.memref_squeeze %78 : memref<1x1x128xf32, #tpu.memory_space<vmem>> -> memref<1x128xf32, #tpu.memory_space<vmem>>
        %80 = tpu.memref_slice %arg11[%76] : memref<16x!tpu.dma_semaphore, #tpu.memory_space<semaphore_mem>> -> memref<1x!tpu.dma_semaphore, #tpu.memory_space<semaphore_mem>>
        %81 = tpu.memref_squeeze %80 : memref<1x!tpu.dma_semaphore, #tpu.memory_space<semaphore_mem>> -> memref<!tpu.dma_semaphore, #tpu.memory_space<semaphore_mem>>
        tpu.enqueue_dma source(%77 : memref<1x128xf32, #tpu.memory_space<any>>) target(%79 : memref<1x128xf32, #tpu.memory_space<vmem>>) target_semaphore(%81 : memref<!tpu.dma_semaphore, #tpu.memory_space<semaphore_mem>>)
      }
      %c16_i32_33 = arith.constant 16 : i32
    } else {
    }
    %c0_i32_5 = arith.constant 0 : i32
    %c16_i32 = arith.constant 16 : i32
    %13 = arith.addi %c0_i32_5, %c16_i32 : i32
    %c1_i32_6 = arith.constant 1 : i32
    scf.for %arg12 = %c0_i32_5 to %13 step %c1_i32_6  : i32 {
      %c1_i32_28 = arith.constant 1 : i32
      %59 = arith.muli %arg12, %c1_i32_28 : i32
      %c0_i32_29 = arith.constant 0 : i32
      %60 = arith.addi %c0_i32_29, %59 : i32
      %c16_i32_30 = arith.constant 16 : i32
      %c0_i32_31 = arith.constant 0 : i32
      %61 = arith.cmpi eq, %c16_i32_30, %c0_i32_31 : i32
      %c1_i32_32 = arith.constant 1 : i32
      %62 = arith.select %61, %c1_i32_32, %c16_i32_30 : i32
      %63 = arith.remsi %60, %62 : i32
      %c0_i32_33 = arith.constant 0 : i32
      %64 = arith.cmpi ne, %63, %c0_i32_33 : i32
      %c0_i32_34 = arith.constant 0 : i32
      %65 = arith.cmpi slt, %63, %c0_i32_34 : i32
      %c0_i32_35 = arith.constant 0 : i32
      %66 = arith.cmpi slt, %62, %c0_i32_35 : i32
      %67 = arith.xori %65, %66 : i1
      %68 = arith.andi %67, %64 : i1
      %69 = arith.addi %63, %62 : i32
      %70 = arith.select %68, %69, %63 : i32
      %c0_i32_36 = arith.constant 0 : i32
      %c0_i32_37 = arith.constant 0 : i32
      %71 = tpu.memref_slice %arg3[%c0_i32_36, %c0_i32_37] : memref<128x128xf32, #tpu.memory_space<any>> -> memref<1x128xf32, #tpu.memory_space<any>>
      %c0_i32_38 = arith.constant 0 : i32
      %72 = tpu.memref_slice %arg10[%9, %60, %c0_i32_38] : memref<2x16x128xf32, #tpu.memory_space<vmem>> -> memref<1x1x128xf32, #tpu.memory_space<vmem>>
      %73 = tpu.memref_squeeze %72 : memref<1x1x128xf32, #tpu.memory_space<vmem>> -> memref<1x128xf32, #tpu.memory_space<vmem>>
      %74 = tpu.memref_slice %arg11[%70] : memref<16x!tpu.dma_semaphore, #tpu.memory_space<semaphore_mem>> -> memref<1x!tpu.dma_semaphore, #tpu.memory_space<semaphore_mem>>
      %75 = tpu.memref_squeeze %74 : memref<1x!tpu.dma_semaphore, #tpu.memory_space<semaphore_mem>> -> memref<!tpu.dma_semaphore, #tpu.memory_space<semaphore_mem>>
      tpu.wait_dma2 semaphore(%75 : memref<!tpu.dma_semaphore, #tpu.memory_space<semaphore_mem>>) src(%71 : memref<1x128xf32, #tpu.memory_space<any>>) dst(%73 : memref<1x128xf32, #tpu.memory_space<vmem>>)
    }
    %c16_i32_7 = arith.constant 16 : i32
    %c1_i32_8 = arith.constant 1 : i32
    %14 = arith.addi %arg1, %c1_i32_8 : i32
    %c2_i32_9 = arith.constant 2 : i32
    %15 = arith.cmpi slt, %14, %c2_i32_9 : i32
    %16 = arith.extui %15 : i1 to i32
    %c0_i32_10 = arith.constant 0 : i32
    %17 = arith.cmpi ne, %16, %c0_i32_10 : i32
    scf.if %17 {
      %c1_i32_28 = arith.constant 1 : i32
      %59 = arith.addi %arg1, %c1_i32_28 : i32
      %c1_i32_29 = arith.constant 1 : i32
      %60 = arith.subi %c1_i32_29, %9 : i32
      %c16_i32_30 = arith.constant 16 : i32
      %61 = arith.muli %59, %c16_i32_30 : i32
      %c16_i32_31 = arith.constant 16 : i32
      %62 = arith.muli %arg0, %c16_i32_31 : i32
      %63 = arith.addi %61, %62 : i32
      %c0_i32_32 = arith.constant 0 : i32
      %c16_i32_33 = arith.constant 16 : i32
      %64 = arith.addi %c0_i32_32, %c16_i32_33 : i32
      %c1_i32_34 = arith.constant 1 : i32
      scf.for %arg12 = %c0_i32_32 to %64 step %c1_i32_34  : i32 {
        %c1_i32_36 = arith.constant 1 : i32
        %65 = arith.muli %arg12, %c1_i32_36 : i32
        %c0_i32_37 = arith.constant 0 : i32
        %66 = arith.addi %c0_i32_37, %65 : i32
        %67 = arith.addi %63, %66 : i32
        %68 = arith.index_cast %67 : i32 to index
        %69 = memref.load %arg2[%68] : memref<32xi32, #tpu.memory_space<smem>>
        %c16_i32_38 = arith.constant 16 : i32
        %c0_i32_39 = arith.constant 0 : i32
        %70 = arith.cmpi eq, %c16_i32_38, %c0_i32_39 : i32
        %c1_i32_40 = arith.constant 1 : i32
        %71 = arith.select %70, %c1_i32_40, %c16_i32_38 : i32
        %72 = arith.remsi %66, %71 : i32
        %c0_i32_41 = arith.constant 0 : i32
        %73 = arith.cmpi ne, %72, %c0_i32_41 : i32
        %c0_i32_42 = arith.constant 0 : i32
        %74 = arith.cmpi slt, %72, %c0_i32_42 : i32
        %c0_i32_43 = arith.constant 0 : i32
        %75 = arith.cmpi slt, %71, %c0_i32_43 : i32
        %76 = arith.xori %74, %75 : i1
        %77 = arith.andi %76, %73 : i1
        %78 = arith.addi %72, %71 : i32
        %79 = arith.select %77, %78, %72 : i32
        %c0_i32_44 = arith.constant 0 : i32
        %80 = tpu.memref_slice %arg3[%69, %c0_i32_44] : memref<128x128xf32, #tpu.memory_space<any>> -> memref<1x128xf32, #tpu.memory_space<any>>
        %c0_i32_45 = arith.constant 0 : i32
        %81 = tpu.memref_slice %arg10[%60, %66, %c0_i32_45] : memref<2x16x128xf32, #tpu.memory_space<vmem>> -> memref<1x1x128xf32, #tpu.memory_space<vmem>>
        %82 = tpu.memref_squeeze %81 : memref<1x1x128xf32, #tpu.memory_space<vmem>> -> memref<1x128xf32, #tpu.memory_space<vmem>>
        %83 = tpu.memref_slice %arg11[%79] : memref<16x!tpu.dma_semaphore, #tpu.memory_space<semaphore_mem>> -> memref<1x!tpu.dma_semaphore, #tpu.memory_space<semaphore_mem>>
        %84 = tpu.memref_squeeze %83 : memref<1x!tpu.dma_semaphore, #tpu.memory_space<semaphore_mem>> -> memref<!tpu.dma_semaphore, #tpu.memory_space<semaphore_mem>>
        tpu.enqueue_dma source(%80 : memref<1x128xf32, #tpu.memory_space<any>>) target(%82 : memref<1x128xf32, #tpu.memory_space<vmem>>) target_semaphore(%84 : memref<!tpu.dma_semaphore, #tpu.memory_space<semaphore_mem>>)
      }
      %c16_i32_35 = arith.constant 16 : i32
    } else {
    }
    %18 = arith.index_cast %9 : i32 to index
    %c0 = arith.constant 0 : index
    %c0_11 = arith.constant 0 : index
    %19 = vector.load %arg10[%18, %c0, %c0_11] : memref<2x16x128xf32, #tpu.memory_space<vmem>>, vector<1x16x128xf32>
    %20 = vector.shape_cast %19 : vector<1x16x128xf32> to vector<16x128xf32>
    %c0_12 = arith.constant 0 : index
    %c0_13 = arith.constant 0 : index
    %21 = vector.load %arg4[%c0_12, %c0_13] : memref<16x128xf32, #tpu.memory_space<vmem>>, vector<16x128xf32>
    %c0_14 = arith.constant 0 : index
    %c0_15 = arith.constant 0 : index
    %22 = vector.load %arg5[%c0_14, %c0_15] : memref<2x128xf32, #tpu.memory_space<vmem>>, vector<2x128xf32>
    %c0_16 = arith.constant 0 : index
    %c0_17 = arith.constant 0 : index
    %23 = vector.load %arg6[%c0_16, %c0_17] : memref<16x1xi32, #tpu.memory_space<vmem>>, vector<16x1xi32>
    %24 = vector.extract_strided_slice %22 {offsets = [0, 0], sizes = [1, 128], strides = [1, 1]} : vector<2x128xf32> to vector<1x128xf32>
    %25 = arith.sitofp %23 : vector<16x1xi32> to vector<16x1xf32>
    %26 = vector.extract_strided_slice %22 {offsets = [1, 0], sizes = [1, 128], strides = [1, 1]} : vector<2x128xf32> to vector<1x128xf32>
    %27 = vector.extract_strided_slice %22 {offsets = [0, 0], sizes = [1, 128], strides = [1, 1]} : vector<2x128xf32> to vector<1x128xf32>
    %28 = arith.subf %26, %27 : vector<1x128xf32>
    %29 = vector.broadcast %25 : vector<16x1xf32> to vector<16x128xf32>
    %30 = vector.broadcast %28 : vector<1x128xf32> to vector<16x128xf32>
    %31 = arith.mulf %29, %30 : vector<16x128xf32>
    %32 = vector.broadcast %24 : vector<1x128xf32> to vector<16x128xf32>
    %33 = arith.addf %32, %31 : vector<16x128xf32>
    %34 = arith.addf %20, %21 : vector<16x128xf32>
    %35 = arith.addf %34, %33 : vector<16x128xf32>
    %cst = arith.constant dense<0.000000e+00> : vector<16xf32>
    %36 = vector.multi_reduction <add>, %35, %cst [1] : vector<16x128xf32> to vector<16xf32>
    %37 = vector.shape_cast %36 : vector<16xf32> to vector<16x1xf32>
    %cst_18 = arith.constant 1.280000e+02 : f32
    %38 = vector.broadcast %cst_18 : f32 to vector<16x1xf32>
    %39 = arith.divf %37, %38 : vector<16x1xf32>
    %40 = vector.broadcast %39 : vector<16x1xf32> to vector<16x128xf32>
    %41 = arith.subf %35, %40 : vector<16x128xf32>
    %42 = arith.mulf %41, %41 : vector<16x128xf32>
    %cst_19 = arith.constant dense<0.000000e+00> : vector<16xf32>
    %43 = vector.multi_reduction <add>, %42, %cst_19 [1] : vector<16x128xf32> to vector<16xf32>
    %44 = vector.shape_cast %43 : vector<16xf32> to vector<16x1xf32>
    %cst_20 = arith.constant 1.280000e+02 : f32
    %45 = vector.broadcast %cst_20 : f32 to vector<16x1xf32>
    %46 = arith.divf %44, %45 : vector<16x1xf32>
    %cst_21 = arith.constant 9.99999996E-13 : f32
    %47 = vector.broadcast %cst_21 : f32 to vector<16x1xf32>
    %48 = arith.addf %46, %47 : vector<16x1xf32>
    %49 = math.rsqrt %48 : vector<16x1xf32>
    %50 = vector.broadcast %49 : vector<16x1xf32> to vector<16x128xf32>
    %51 = arith.mulf %41, %50 : vector<16x128xf32>
    %c0_22 = arith.constant 0 : index
    %c0_23 = arith.constant 0 : index
    %52 = vector.load %arg7[%c0_22, %c0_23] : memref<1x128xf32, #tpu.memory_space<vmem>>, vector<1x128xf32>
    %53 = vector.broadcast %52 : vector<1x128xf32> to vector<16x128xf32>
    %54 = arith.mulf %51, %53 : vector<16x128xf32>
    %c0_24 = arith.constant 0 : index
    %c0_25 = arith.constant 0 : index
    %55 = vector.load %arg8[%c0_24, %c0_25] : memref<1x128xf32, #tpu.memory_space<vmem>>, vector<1x128xf32>
    %56 = vector.broadcast %55 : vector<1x128xf32> to vector<16x128xf32>
    %57 = arith.addf %54, %56 : vector<16x128xf32>
    %c0_26 = arith.constant 0 : index
    %c0_27 = arith.constant 0 : index
    %58 = vector.load %arg9[%c0_26, %c0_27] : memref<16x128xf32, #tpu.memory_space<vmem>>, vector<16x128xf32>
    tpu.vector_store %arg9[%c0_26, %c0_27], %57 {strides = array<i32>} : memref<16x128xf32, #tpu.memory_space<vmem>>, vector<16x128xf32>,
    return
  }
  func.func @transform_1(%arg0: i32, %arg1: i32, %arg2: memref<32xi32, #tpu.memory_space<smem>>) -> (i32, i32) {
    %c0_i32 = arith.constant 0 : i32
    %c0_i32_0 = arith.constant 0 : i32
    return %arg0, %c0_i32 : i32, i32
  }
  func.func @transform_2(%arg0: i32, %arg1: i32, %arg2: memref<32xi32, #tpu.memory_space<smem>>) -> (i32, i32) {
    %c0_i32 = arith.constant 0 : i32
    %c0_i32_0 = arith.constant 0 : i32
    %c0_i32_1 = arith.constant 0 : i32
    return %c0_i32, %c0_i32_0 : i32, i32
  }
  func.func @transform_3(%arg0: i32, %arg1: i32, %arg2: memref<32xi32, #tpu.memory_space<smem>>) -> (i32, i32) {
    %c1_i32 = arith.constant 1 : i32
    %0 = arith.muli %arg1, %c1_i32 : i32
    %1 = arith.addi %0, %arg0 : i32
    %c0_i32 = arith.constant 0 : i32
    %c0_i32_0 = arith.constant 0 : i32
    return %1, %c0_i32 : i32, i32
  }
  func.func @transform_4(%arg0: i32, %arg1: i32, %arg2: memref<32xi32, #tpu.memory_space<smem>>) -> (i32, i32) {
    %c0_i32 = arith.constant 0 : i32
    %c0_i32_0 = arith.constant 0 : i32
    %c0_i32_1 = arith.constant 0 : i32
    return %c0_i32, %c0_i32_0 : i32, i32
  }
  func.func @transform_5(%arg0: i32, %arg1: i32, %arg2: memref<32xi32, #tpu.memory_space<smem>>) -> (i32, i32) {
    %c0_i32 = arith.constant 0 : i32
    %c0_i32_0 = arith.constant 0 : i32
    %c0_i32_1 = arith.constant 0 : i32
    return %c0_i32, %c0_i32_0 : i32, i32
  }
  func.func @transform_6(%arg0: i32, %arg1: i32, %arg2: memref<32xi32, #tpu.memory_space<smem>>) -> (i32, i32) {
    %c1_i32 = arith.constant 1 : i32
    %0 = arith.muli %arg1, %c1_i32 : i32
    %1 = arith.addi %0, %arg0 : i32
    %c0_i32 = arith.constant 0 : i32
    %c0_i32_0 = arith.constant 0 : i32
    return %1, %c0_i32 : i32, i32
  }
}

</mosaic_0001>

<bundles_post_ra>
// kernel: tpu_custom_call.1
= control target key start
LH: loop header
LB: loop body
LE: loop exit
PB: predicated region body
PF: predicated region fallthrough
CT: control target
= control target key end

     0   :  { %s1049_s27 = smov [#allocation5]   ;;  %s1285_s0 = inlined_call_operand.vmem [shape: s32[32], index: 0, kind: input, shape index: {}]   ;;  %s1286_s1 = inlined_call_operand.hbm [shape: f32[128,128], index: 1, kind: input, shape index: {}]   ;;  %s1287_s2 = inlined_call_operand.vmem [shape: f32[16,128], index: 2, kind: input, shape index: {}]   ;;  %s1288_s3 = inlined_call_operand.vmem [shape: f32[2,128], index: 3, kind: input, shape index: {}]   ;;  %s1289_s4 = inlined_call_operand.vmem [shape: s32[32,1], index: 4, kind: input, shape index: {}]   ;;  %s1290_s5 = inlined_call_operand.vmem [shape: f32[1,128], index: 5, kind: input, shape index: {}]   ;;  %s1291_s6 = inlined_call_operand.vmem [shape: f32[1,128], index: 6, kind: input, shape index: {}]   ;;  %s1292_s7 = inlined_call_operand.hbm [shape: f32[32,128], index: 7, kind: output, shape index: {}]  }
   0x1   :  { %1298 = sst [smem:[#allocation23_spill]] %s1289_s4  ;;  %s13_s26 = sshll.u32 %s1285_s0, 4  ;;  %s14_s26 = int_to_ptr.vmem [resolvable:$true] %s13_s26 }
   0x2   :  { %16 = dma.vmem_to_smem %s14_s26, 16, %s1049_s27, [#allocation4] }
   0x3   :  { %1005 = dma.done.wait [#allocation4], 16 }
   0x4   :  { %1006 = vsyncadd [#allocation4], 4294967280 }
   0x5   :  { %19 = sfence }
   0x6   :  { %20 = vsyncpa [#allocation7], 0 }
   0x7   :  { %22 = vsyncpa [#allocation7 + $0x1], 0  ;;  %s1099_s28 = smov 0   ;;  %s1101_s29 = smov 0  }
   0x8   :  { %s1103_s30 = smov 0   ;;  %s1105_s8 = smov 0  }
   0x9   :  { %s1107_s9 = smov 0   ;;  %s1109_s10 = smov 0  }
   0xa LB: > { %1299 = sst [smem:[#allocation17_spill]] %s1023_s30  ;;  %s738_s0 = sadd.s32 4294967295, %s1035_s10   ;;  %s1035_s10 = sphi %s1109_s10, %s28_s10   ;;  %s1031_s9 = sphi %s1107_s9, %s1315_s9   ;;  %s1027_s8 = sphi %s1105_s8, %s1314_s8   ;;  %s1023_s30 = sphi %s1103_s30, %s1313_s30   ;;  %s1019_s29 = sphi %s1101_s29, %s1317_s29   ;;  %s1015_s28 = sphi %s1099_s28, %s1316_s28  }
   0xb   : > { %1300 = sst [smem:[#allocation18_spill]] %s1031_s9  ;;  %s739_s11 = sadd.s32 4294967294, %s1035_s10  }
   0xc   : > { %s37_s12 = sadd.s32 1, %s1031_s9  ;;  %s166_s13 = sadd.s32 1, %s1023_s30 }
   0xd   : > { %p38_p0 = scmp.ge.s32.totalorder %s37_s12, 2  ;;  %p176_p1 = scmp.ne.s32.totalorder %s1023_s30, %s1019_s29 }
   0xe   : > { %p177_p2 = scmp.eq.s32.totalorder %s738_s0, 1  ;;  %p182_p3 = scmp.ne.s32.totalorder %s1019_s29, %s1015_s28 }
   0xf   : > { %s1319_s12 = smov (%p38_p0, %s37_s12), 0  ;;  %p183_p5 = scmp.eq.s32.totalorder %s739_s11, 1 }
  0x10   : > { %1301 = sst [smem:[#allocation19_spill]] %s1319_s12  ;;  %p1139_p4 = por %p177_p2, %p176_p1 }
  0x11   : > { %s163_s15 = ssub.s32 %s1031_s9, %s1319_s12  ;;  %p743_p6 = scmp.ge.s32.totalorder %s1035_s10, 1 }
  0x12   : > { %p164_p7 = scmp.eq.s32.totalorder %s163_s15, 0  ;;  %p1146_p8 = por %p183_p5, %p182_p3 }
  0x13   : > { %p230_p9 = scmp.lt.s32.totalorder %s1035_s10, 3 }
  0x14   : > { %s1303_s16 = scalar_select %p1146_p8, 1, 0 }
  0x15   : > { %s1152_s17 = scalar_select %p164_p7, %s1023_s30, %s166_s13  }
  0x16   : > { %1304 = sst [smem:[#allocation20_spill]] %s1303_s16  ;;  %p231_p10 = pnand %p743_p6, %p230_p9 }
  0x17   : > { %1305 = sst [smem:[#allocation21_spill]] %s1152_s17 }
  0x18   : > { %234 = sbr.rel (%p231_p10) target bundleno = 549 (0x225), region = 40 }
  0x1d   : > { %s1293_s18 = sand.u32 1, %s1019_s29   ;;  %s745_s19 = sshll.u32 %s1027_s8, 1 }
  0x1e   : > { %s744_s20 = sshll.u32 %s1293_s18, 4  ;;  %p272_p11 = scmp.lt.s32.totalorder %s745_s19, 3 }
  0x1f   : > { %p280_p12 = scmp.lt.s32.totalorder %s1027_s8, 0  ;;  %s281_s21 = ssub.s32 0, %s1027_s8 }
  0x20   : > { %s1321_s19 = smov (!%p272_p11, %s745_s19), 3  ;;  %s747_s23 = smin.u32 %s1027_s8, %s281_s21 }
  0x21   : > { %s746_s22 = sshll.u32 %s1321_s19, 3  ;;  %s1306_s4 = sld [smem:[#allocation23_spill]] }
  0x22   : > { %s283_s27 = sand.u32 1, %s747_s23   ;;  %s1168_s13 = scalar_lea.vmem [#allocation6], %s744_s20 }
  0x23   : > { %s284_s0 = ssub.s32 0, %s283_s27  ;;  %p750_p0 = scmp.ne.s32.totalorder %s1027_s8, 0 }
  0x24   : > { %s1323_s0 = smov (!%p280_p12, %s284_s0), %s283_s27  ;;  %s1171_s15 = smov (!%p750_p0), 0  }
  0x25   : > { %p749_p13 = scmp.lt.s32.totalorder %s1323_s0, 0  ;;  %s290_s11 = sadd.s32 2, %s1323_s0 }
  0x26   : > { %295 = sbr.rel (%p750_p0) target bundleno = 80 (0x50), region = 44 }
  0x27   : > { %s1164_s26 = scalar_lea.vmem %s1306_s4, %s746_s22  ;;  %s1325_s11 = smov (!%p749_p13, %s290_s11), %s1323_s0 }
  0x2b LB: >> { %s304_s19 = sld [smem:[#allocation5 + %s1039_s15]]  ;;  %p305_p1 = scmp.lt.s32.totalorder %s1039_s15, 0  ;;  %s1039_s15 = sphi %s1171_s15, %s302_s15  }
  0x2c   : >> { %s306_s21 = ssub.s32 0, %s1039_s15  ;;  %s318_s24 = scalar_lea.vmem [#allocation2], %s1039_s15 }
  0x2d   : >> { %s751_s20 = smin.u32 %s1039_s15, %s306_s21  ;;  %s1181_s25 = sshll.u32 %s318_s24, 4  ;;  %s330_s25 = int_to_ptr.vmem [resolvable:$true] %s1181_s25 }
  0x2e   : >> { %s308_s22 = sand.u32 15, %s751_s20   ;;  %s897_s30 = scalar_lea.hbm %s1286_s1, 128 }
  0x2f   : >> { %s309_s23 = ssub.s32 0, %s308_s22 }
  0x30   : >> { %s1327_s23 = smov (!%p305_p1, %s309_s23), %s308_s22 }
  0x31   : >> { %s317_s18 = scalar_lea.hbm %s1286_s1, %s304_s19  ;;  %p753_p2 = scmp.lt.s32.totalorder %s1327_s23, 0 }
  0x32   : >> { %s315_s4 = sadd.s32 16, %s1327_s23  ;;  %s327_s12 = sshll.u32 %s317_s18, 4  ;;  %s328_s12 = int_to_ptr.hbm [resolvable:$true] %s327_s12 }
  0x33   : >> { %s1329_s4 = smov (!%p753_p2, %s315_s4), %s1327_s23  ;;  %s893_s17 = sshra.s32 %s328_s12, 4  ;;  %s894_s17 = int_to_ptr.hbm [resolvable:$true] %s893_s17 }
  0x34   : >> { %s319_s9 = scalar_lea.sflag [#allocation3], %s1329_s4  ;;  %s895_s21 = scalar_lea.hbm %s894_s17, 1 }
  0x35   : >> { %p896_p3 = scmp.ne.s32.totalorder %s894_s17, %s895_s21  ;;  %p898_p5 = scmp.lt.s32.totalorder %s894_s17, %s1286_s1 }
  0x36   : >> { %p899_p6 = scmp.lt.s32.totalorder %s897_s30, %s895_s21 }
  0x38   : >> { %p900_p7 = por %p899_p6, %p898_p5 }
  0x3a   : >> { %p901_p9 = pnand %p900_p7, %p896_p3 }
  0x3c   : >> { %904 = shalt.err (!%p901_p9)  }
  0x3d   : >> { %s905_s18 = sshra.s32 %s330_s25, 4  ;;  %s1050_s4 = smov [#allocation2]   ;;  %s906_s18 = int_to_ptr.vmem [resolvable:$true] %s905_s18 }
  0x3e   : >> { %s907_s19 = scalar_lea.vmem %s906_s18, 1  ;;  %s909_s23 = scalar_lea.vmem %s1050_s4, 32 }
  0x3f   : >> { %p908_p10 = scmp.ne.s32.totalorder %s906_s18, %s907_s19  ;;  %p910_p11 = scmp.lt.s32.totalorder %s906_s18, [#allocation2] }
  0x40   : >> { %p911_p12 = scmp.lt.s32.totalorder %s909_s23, %s907_s19 }
  0x42   : >> { %p912_p13 = por %p911_p12, %p910_p11 }
  0x44   : >> { %p913_p0 = pnand %p912_p13, %p908_p10 }
  0x46   : >> { %916 = shalt.err (!%p913_p0)  }
  0x47   : >> { %332 = dma.hbm_to_vmem [thread:$0]  %s328_s12, 16, %s330_s25, %s319_s9 }
  0x48   : >> { %s302_s15 = sadd.s32 1, %s1039_s15  }
  0x49   : >> { %p299_p1 = scmp.ge.s32.totalorder %s302_s15, 16  }
  0x4b   : > { %301 = sbr.rel (!%p299_p1) target bundleno = 43 (0x2b), region = 138 }
  0x50 PF: > { %s1041_s30 = smov 0  }
  0x51 LB: >> { %p339_p2 = scmp.lt.s32.totalorder %s1043_s30, 0  ;;  %s340_s16 = ssub.s32 0, %s1043_s30  ;;  %s1043_s30 = sphi %s1041_s30, %s338_s30  }
  0x52   : >> { %s754_s17 = smin.u32 %s1043_s30, %s340_s16 }
  0x53   : >> { %s342_s27 = sand.u32 15, %s754_s17  }
  0x54   : >> { %s343_s0 = ssub.s32 0, %s342_s27 }
  0x55   : >> { %s1331_s0 = smov (!%p339_p2, %s343_s0), %s342_s27 }
  0x56   : >> { %p756_p3 = scmp.lt.s32.totalorder %s1331_s0, 0  ;;  %s349_s21 = sadd.s32 16, %s1331_s0 }
  0x58   : >> { %s1333_s21 = smov (!%p756_p3, %s349_s21), %s1331_s0 }
  0x59   : >> { %s351_s9 = scalar_lea.sflag [#allocation3], %s1333_s21 }
  0x5a   : >> { %1007 = dma.done.wait %s351_s9, 16 }
  0x5b   : >> { %1008 = vsyncadd %s351_s9, 4294967280  ;;  %s338_s30 = sadd.s32 1, %s1043_s30  }
  0x5c   : >> { %p335_p5 = scmp.ge.s32.totalorder %s338_s30, 16  }
  0x5d   : > { %s355_s12 = sadd.s32 (%p335_p5), 1, %s1027_s8 }
  0x5e   : > { %337 = sbr.rel (!%p335_p5) target bundleno = 81 (0x51), region = 149  ;;  %p757_p6 = scmp.ge.s32.totalorder (%p335_p5), %s355_s12, 2 }
  0x63   : > { %359 = sbr.rel (%p757_p6) target bundleno = 147 (0x93), region = 66  ;;  %s785_s25 = sshll.u32 (!%p757_p6), %s1027_s8, 4 }
  0x64   : > { %s1199_s20 = sadd.s32 (!%p757_p6), 16, %s785_s25  ;;  %s1201_s24 = smov (!%p757_p6), 0  }
  0x65   : > { %1307 = sst [smem:[#allocation22_spill]] (!%p757_p6), %s1199_s20 }
  0x68 LB: >> { %s1308_s20 = sld [smem:[#allocation22_spill]]  ;;  %s1309_s15 = ssub.s32 1, %s1325_s11  ;;  %s1047_s24 = sphi %s1201_s24, %s369_s24  }
  0x69   : >> { %s762_s22 = sshll.u32 %s1309_s15, 4  ;;  %p372_p7 = scmp.lt.s32.totalorder %s1047_s24, 0 }
  0x6a   : >> { %s373_s4 = ssub.s32 0, %s1047_s24  ;;  %s386_s30 = sadd.s32 %s1047_s24, %s762_s22 }
  0x6b   : >> { %s759_s23 = smin.u32 %s1047_s24, %s373_s4  ;;  %s387_s27 = scalar_lea.vmem [#allocation2], %s386_s30 }
  0x6c   : >> { %s375_s16 = sand.u32 15, %s759_s23   ;;  %s398_s0 = sshll.u32 %s387_s27, 4  ;;  %s399_s0 = int_to_ptr.vmem [resolvable:$true] %s398_s0 }
  0x6d   : >> { %s376_s17 = ssub.s32 0, %s375_s16  ;;  %s921_s30 = scalar_lea.hbm %s1286_s1, 128 }
  0x6e   : >> { %s370_s18 = sadd.s32 %s1047_s24, %s1308_s20  ;;  %s1335_s17 = smov (!%p372_p7, %s376_s17), %s375_s16 }
  0x6f   : >> { %s371_s19 = sld [smem:[#allocation5 + %s370_s18]]  ;;  %p761_p9 = scmp.lt.s32.totalorder %s1335_s17, 0 }
  0x70   : >> { %s382_s21 = sadd.s32 16, %s1335_s17 }
  0x71   : >> { %s1337_s21 = smov (!%p761_p9, %s382_s21), %s1335_s17 }
  0x72   : >> { %s388_s20 = scalar_lea.sflag [#allocation3], %s1337_s21 }
  0x75   : >> { %s384_s25 = scalar_lea.hbm %s1286_s1, %s371_s19 }
  0x76   : >> { %s396_s15 = sshll.u32 %s384_s25, 4  ;;  %s397_s15 = int_to_ptr.hbm [resolvable:$true] %s396_s15 }
  0x77   : >> { %s917_s18 = sshra.s32 %s397_s15, 4  ;;  %s918_s18 = int_to_ptr.hbm [resolvable:$true] %s917_s18 }
  0x78   : >> { %s919_s4 = scalar_lea.hbm %s918_s18, 1  ;;  %p922_p11 = scmp.lt.s32.totalorder %s918_s18, %s1286_s1 }
  0x79   : >> { %p920_p10 = scmp.ne.s32.totalorder %s918_s18, %s919_s4  ;;  %p923_p12 = scmp.lt.s32.totalorder %s921_s30, %s919_s4 }
  0x7b   : >> { %p924_p13 = por %p923_p12, %p922_p11 }
  0x7d   : >> { %p925_p0 = pnand %p924_p13, %p920_p10 }
  0x7f   : >> { %928 = shalt.err (!%p925_p0)  }
  0x80   : >> { %s929_s19 = sshra.s32 %s399_s0, 4  ;;  %s1051_s21 = smov [#allocation2]   ;;  %s930_s19 = int_to_ptr.vmem [resolvable:$true] %s929_s19 }
  0x81   : >> { %s931_s17 = scalar_lea.vmem %s930_s19, 1  ;;  %s933_s9 = scalar_lea.vmem %s1051_s21, 32 }
  0x82   : >> { %p932_p1 = scmp.ne.s32.totalorder %s930_s19, %s931_s17  ;;  %p934_p2 = scmp.lt.s32.totalorder %s930_s19, [#allocation2] }
  0x83   : >> { %p935_p3 = scmp.lt.s32.totalorder %s933_s9, %s931_s17 }
  0x85   : >> { %p936_p5 = por %p935_p3, %p934_p2 }
  0x87   : >> { %p937_p6 = pnand %p936_p5, %p932_p1 }
  0x89   : >> { %940 = shalt.err (!%p937_p6)  }
  0x8a   : >> { %401 = dma.hbm_to_vmem [thread:$0]  %s397_s15, 16, %s399_s0, %s388_s20 }
  0x8b   : >> { %s369_s24 = sadd.s32 1, %s1047_s24  }
  0x8c   : >> { %p366_p7 = scmp.ge.s32.totalorder %s369_s24, 16  }
  0x8e   : > { %368 = sbr.rel (!%p366_p7) target bundleno = 104 (0x68), region = 160 }
  0x93 PF: > { %v409_v0 = vld [vmem:[%s1164_s26] sm:$0xff]  ;;  %v1052_v1 = vmov 0   ;;  %v410_v3 = vld [vmem:[%s1164_s26 + $0x8] sm:$0xff]  ;;  %s763_s20 = sshll.u32 %s1325_s11, 4  ;;  %v1053_v24 = vmov 128.0   ;;  %s787_s30 = sshll.u32 %s1027_s8, 4 }
  0x94   : > { %872 = vset.pattern.permute.xlu0 %v1052_v1  ;;  %v411_v2 = vcvt.s32.f32 %v409_v0  ;;  %v412_v4 = vcvt.s32.f32 %v410_v3  ;;  %v408_v5 = vld [vmem:[%s1288_s3] sm:$0x3]  ;;  %s403_s24 = scalar_lea.vmem [#allocation2], %s763_s20  ;;  %v407_v18 = vld [vmem:[%s1287_s2 + $0x8] sm:$0xff]  ;;  %875 = vrcp.f32 %v1053_v24  ;;  %s511_s19 = scalar_lea.hbm %s1292_s7, %s787_s30 }
  0x95   : > { %v414_v6 = vrot.slane %v408_v5, 7  ;;  %v404_v9 = vld [vmem:[%s403_s24] sm:$0xff]  ;;  %v430_v11 = vperm.slane %v408_v5, 0  ;;  %v405_v17 = vld [vmem:[%s403_s24 + $0x8] sm:$0xff]  ;;  %s512_s17 = sshll.u32 %s1168_s13, 4  ;;  %s514_s21 = sshll.u32 %s511_s19, 4  ;;  %s513_s17 = int_to_ptr.vmem [resolvable:$true] %s512_s17  ;;  %s515_s21 = int_to_ptr.hbm [resolvable:$true] %s514_s21 }
  0x96   : > { %419 = vperm.xlu0 %872, %v411_v2   ;;  %v406_v10 = vld [vmem:[%s1287_s2] sm:$0xff]  ;;  %v434_v21 = vadd.f32 %v407_v18, %v405_v17  ;;  %s1310_s8 = sand.u32 1, %s1019_s29   ;;  %s955_s12 = sshra.s32 %s515_s21, 4  ;;  %s956_s12 = int_to_ptr.hbm [resolvable:$true] %s955_s12 }
  0x97   : > { %v416_v7 = vsub.f32 %v408_v5, %v414_v6  ;;  %v433_v14 = vadd.f32 %v406_v10, %v404_v9  ;;  %v873_v53 = vld [vmem:[%s1290_s5] ss:$0 sm:$0xff]  ;;  %s499_s9 = scalar_lea.sflag [#allocation7], %s1310_s8  ;;  %s957_s15 = scalar_lea.hbm %s956_s12, 16 }
  0x98   : > { %v874_v57 = vld [vmem:[%s1291_s6] ss:$0 sm:$0xff]  ;;  %p958_p9 = scmp.ne.s32.totalorder %s956_s12, %s957_s15  ;;  %s961_s0 = scalar_lea.hbm %s1292_s7, 32 }
  0x99   : > { %v427_v8 = vperm.slane %v416_v7, 1  ;;  %p962_p12 = scmp.lt.s32.totalorder %s956_s12, %s1292_s7  ;;  %p963_p13 = scmp.lt.s32.totalorder %s961_s0, %s957_s15 }
  0x9a   : > { %v876_v25 = vpop.eup %875  ;;  %p959_p10 = pnand %p958_p9, %p1139_p4 }
  0x9b   : > { %v442_v26 = vmul.f32 128.0, %v876_v25  ;;  %vm446_vm0 = vweird.f32 %v876_v25  ;;  %p964_p0 = por %p963_p13, %p962_p12 }
  0x9c   : > { %p960_p11 = pneg %p959_p10 }
  0x9d   : > { %v443_v27 = vsub.f32 1.0, %v442_v26 }
  0x9e   : > { %424 = vperm.xlu0 %872, %v412_v4   ;;  %p965_p1 = pnand %p964_p0, %p960_p11 }
  0x9f   : > { %v444_v28 = vmul.f32 %v876_v25, %v443_v27 }
  0xa1   : > { %v445_v29 = vadd.f32 %v876_v25, %v444_v28 }
  0xa3   : > { %v447_v30 = vsel %vm446_vm0, %v876_v25, %v445_v29 }
 0x108   : > { %v420_v12 = vpop.permute.xlu0 %419 }
 0x109   : > { %v428_v13 = vmul.f32 %v427_v8, %v420_v12 }
 0x10b   : > { %v431_v15 = vadd.f32 %v430_v11, %v428_v13 }
 0x10d   : > { %v435_v16 = vadd.f32 %v433_v14, %v431_v15 }
 0x10f   : > { %437 = vadd.xlane.f32.xlu1 %v435_v16 }
 0x110   : > { %v425_v19 = vpop.permute.xlu0 %424 }
 0x111   : > { %v429_v20 = vmul.f32 %v427_v8, %v425_v19 }
 0x113   : > { %v432_v22 = vadd.f32 %v430_v11, %v429_v20 }
 0x115   : > { %v436_v23 = vadd.f32 %v434_v21, %v432_v22 }
 0x117   : > { %439 = vadd.xlane.f32.xlu1 %v436_v23 }
 0x182   : > { %v438_v31 = vpop.xlane.xlu1 %437 }
 0x183   : > { %v448_v32 = vmul.f32 %v447_v30, %v438_v31 }
 0x185   : > { %v450_v33 = vsub.f32 %v435_v16, %v448_v32 }
 0x187   : > { %v452_v34 = vmul.f32 %v450_v33, %v450_v33 }
 0x189   : > { %454 = vadd.xlane.f32.xlu2 %v452_v34 }
 0x18a   : > { %v440_v35 = vpop.xlane.xlu1 %439 }
 0x18b   : > { %v449_v36 = vmul.f32 %v447_v30, %v440_v35 }
 0x18d   : > { %v451_v37 = vsub.f32 %v436_v23, %v449_v36 }
 0x18f   : > { %v453_v38 = vmul.f32 %v451_v37, %v451_v37 }
 0x191   : > { %456 = vadd.xlane.f32.xlu2 %v453_v38 }
 0x1fc   : > { %v455_v39 = vpop.xlane.xlu2 %454 }
 0x1fd   : > { %v458_v40 = vmul.f32 %v455_v39, %v447_v30 }
 0x1ff   : > { %v460_v41 = vadd.f32 1e-12, %v458_v40 }
 0x201   : > { %877 = vrsqrt.f32 %v460_v41  ;;  %vm468_vm2 = vweird.f32 %v460_v41 }
 0x204   : > { %v457_v42 = vpop.xlane.xlu2 %456 }
 0x205   : > { %v459_v43 = vmul.f32 %v457_v42, %v447_v30 }
 0x207   : > { %v878_v44 = vpop.eup %877  ;;  %v461_v45 = vadd.f32 1e-12, %v459_v43 }
 0x208   : > { %v463_v46 = vmul.f32 %v878_v44, %v460_v41  ;;  %vm469_vm1 = vweird.f32 %v878_v44 }
 0x209   : > { %879 = vrsqrt.f32 %v461_v45  ;;  %vm470_vm3 = vmor %vm468_vm2, %vm469_vm1  ;;  %vm478_vm5 = vweird.f32 %v461_v45 }
 0x20a   : > { %v464_v47 = vmul.f32 %v878_v44, %v463_v46 }
 0x20c   : > { %v465_v48 = vmul.f32 0.5, %v464_v47 }
 0x20e   : > { %v466_v49 = vsub.f32 1.5, %v465_v48 }
 0x20f   : > { %v880_v50 = vpop.eup %879 }
 0x210   : > { %v467_v51 = vmul.f32 %v878_v44, %v466_v49  ;;  %v473_v52 = vmul.f32 %v880_v50, %v461_v45  ;;  %vm479_vm4 = vweird.f32 %v880_v50 }
 0x211   : > { %vm480_vm6 = vmor %vm478_vm5, %vm479_vm4 }
 0x212   : > { %v471_v54 = vsel %vm470_vm3, %v878_v44, %v467_v51  ;;  %v474_v55 = vmul.f32 %v880_v50, %v473_v52 }
 0x213   : > { %v482_v56 = vmul.f32 %v471_v54, %v450_v33 }
 0x214   : > { %v475_v58 = vmul.f32 0.5, %v474_v55 }
 0x215   : > { %v488_v59 = vmul.f32 %v873_v53, %v482_v56 }
 0x216   : > { %v476_v60 = vsub.f32 1.5, %v475_v58 }
 0x217   : > { %v494_v61 = vadd.f32 %v874_v57, %v488_v59 }
 0x218   : > { %v477_v62 = vmul.f32 %v880_v50, %v476_v60 }
 0x219   : > { %496 = vst [vmem:[%s1168_s13] sm:$0xff] %v494_v61 }
 0x21a   : > { %v481_v63 = vsel %vm480_vm6, %v880_v50, %v477_v62 }
 0x21b   : > { %v483_v0 = vmul.f32 %v481_v63, %v451_v37 }
 0x21d   : > { %v489_v1 = vmul.f32 %v873_v53, %v483_v0 }
 0x21f   : > { %v495_v2 = vadd.f32 %v874_v57, %v489_v1 }
 0x221   : > { %497 = vst [vmem:[%s1168_s13 + $0x8] sm:$0xff] %v495_v2 }
 0x222   : > { %968 = shalt.err (!%p965_p1)
}
 0x223   : > { %s1054_s13 = smov 128   ;;  %s1055_s18 = smov 8  }
 0x224   : > { %788 = dma.vmem_to_hbm [thread:$0]  (%p1139_p4), %s513_s17, 256, %s515_s21, %s499_s9, %s1054_s13, %s1054_s13, %s1055_s18  }
 0x225 PF: > { %p794_p2 = scmp.ge.s32.totalorder %s1035_s10, 2  ;;  %s529_s4 = sand.u32 1, %s1015_s28  }
 0x226   : > { %s530_s22 = scalar_lea.sflag [#allocation7], %s529_s4 }
 0x227   : > { %p791_p3 = pnand %p794_p2, %p1146_p8 }
 0x229   : > { %p792_p5 = pneg %p791_p3 }
 0x22b   : > { %1010 = dma.done.wait (%p792_p5), %s530_s22, 256  }
 0x22c   : > { %1012 = vsyncadd (%p792_p5), %s530_s22, 4294967040  ;;  %s28_s10 = sadd.s32 1, %s1035_s10   ;;  %s1312_s23 = sld [smem:[#allocation17_spill]] }
 0x22d   : > { %p25_p6 = scmp.ge.s32.totalorder %s28_s10, 4   ;;  %s1313_s30 = sld [smem:[#allocation21_spill]] }
 0x22e   : > { %s1314_s8 = sld [smem:[#allocation18_spill]]  ;;  %s1316_s28 = smov %s1019_s29 }
 0x22f   : > { %s1315_s9 = sld [smem:[#allocation19_spill]]  ;;  %27 = sbr.rel (!%p25_p6) target bundleno = 10 (0xa), region = 171 }
 0x232   : > { %s1317_s29 = smov %s1312_s23 }
 0x234   :  { %536 = vsyncpa [#allocation7], 1 }
 0x235   :  { %538 = vsyncpa [#allocation7 + $0x1], 1 }
 0x236   :  { %539 = vsyncmov [#allocation3] }
 0x239   :  { %s540_s14 = vpop.sfrf %539 }
 0x23a   :  { %p769_p4 = scmp.ne.s32.totalorder %s540_s14, 0 }
 0x23c   :  { %544 = shalt.err (%p769_p4)  }
 0x23d   :  { %546 = vsyncmov [#allocation3 + $0x1] }
 0x240   :  { %s547_s16 = vpop.sfrf %546 }
 0x241   :  { %p770_p8 = scmp.ne.s32.totalorder %s547_s16, 0 }
 0x243   :  { %551 = shalt.err (%p770_p8)  }
 0x244   :  { %553 = vsyncmov [#allocation3 + $0x2] }
 0x247   :  { %s554_s27 = vpop.sfrf %553 }
 0x248   :  { %p771_p7 = scmp.ne.s32.totalorder %s554_s27, 0 }
 0x24a   :  { %558 = shalt.err (%p771_p7)  }
 0x24b   :  { %560 = vsyncmov [#allocation3 + $0x3] }
 0x24e   :  { %s561_s19 = vpop.sfrf %560 }
 0x24f   :  { %p772_p9 = scmp.ne.s32.totalorder %s561_s19, 0 }
 0x251   :  { %565 = shalt.err (%p772_p9)  }
 0x252   :  { %567 = vsyncmov [#allocation3 + $0x4] }
 0x255   :  { %s568_s10 = vpop.sfrf %567 }
 0x256   :  { %p773_p10 = scmp.ne.s32.totalorder %s568_s10, 0 }
 0x258   :  { %572 = shalt.err (%p773_p10)  }
 0x259   :  { %574 = vsyncmov [#allocation3 + $0x5] }
 0x25c   :  { %s575_s1 = vpop.sfrf %574 }
 0x25d   :  { %p774_p11 = scmp.ne.s32.totalorder %s575_s1, 0 }
 0x25f   :  { %579 = shalt.err (%p774_p11)  }
 0x260   :  { %581 = vsyncmov [#allocation3 + $0x6] }
 0x263   :  { %s582_s2 = vpop.sfrf %581 }
 0x264   :  { %p775_p12 = scmp.ne.s32.totalorder %s582_s2, 0 }
 0x266   :  { %586 = shalt.err (%p775_p12)  }
 0x267   :  { %588 = vsyncmov [#allocation3 + $0x7] }
 0x26a   :  { %s589_s3 = vpop.sfrf %588 }
 0x26b   :  { %p776_p13 = scmp.ne.s32.totalorder %s589_s3, 0 }
 0x26d   :  { %593 = shalt.err (%p776_p13)  }
 0x26e   :  { %595 = vsyncmov [#allocation3 + $0x8] }
 0x271   :  { %s596_s5 = vpop.sfrf %595 }
 0x272   :  { %p777_p0 = scmp.ne.s32.totalorder %s596_s5, 0 }
 0x274   :  { %600 = shalt.err (%p777_p0)  }
 0x275   :  { %602 = vsyncmov [#allocation3 + $0x9] }
 0x278   :  { %s603_s6 = vpop.sfrf %602 }
 0x279   :  { %p778_p1 = scmp.ne.s32.totalorder %s603_s6, 0 }
 0x27b   :  { %607 = shalt.err (%p778_p1)  }
 0x27c   :  { %609 = vsyncmov [#allocation3 + $0xa] }
 0x27f   :  { %s610_s7 = vpop.sfrf %609 }
 0x280   :  { %p779_p2 = scmp.ne.s32.totalorder %s610_s7, 0 }
 0x282   :  { %614 = shalt.err (%p779_p2)  }
 0x283   :  { %616 = vsyncmov [#allocation3 + $0xb] }
 0x286   :  { %s617_s28 = vpop.sfrf %616 }
 0x287   :  { %p780_p3 = scmp.ne.s32.totalorder %s617_s28, 0 }
 0x289   :  { %621 = shalt.err (%p780_p3)  }
 0x28a   :  { %623 = vsyncmov [#allocation3 + $0xc] }
 0x28d   :  { %s624_s29 = vpop.sfrf %623 }
 0x28e   :  { %p781_p5 = scmp.ne.s32.totalorder %s624_s29, 0 }
 0x290   :  { %628 = shalt.err (%p781_p5)  }
 0x291   :  { %630 = vsyncmov [#allocation3 + $0xd] }
 0x294   :  { %s631_s30 = vpop.sfrf %630 }
 0x295   :  { %p782_p6 = scmp.ne.s32.totalorder %s631_s30, 0 }
 0x297   :  { %635 = shalt.err (%p782_p6)  }
 0x298   :  { %637 = vsyncmov [#allocation3 + $0xe] }
 0x29b   :  { %s638_s17 = vpop.sfrf %637 }
 0x29c   :  { %p783_p4 = scmp.ne.s32.totalorder %s638_s17, 0 }
 0x29e   :  { %642 = shalt.err (%p783_p4)  }
 0x29f   :  { %644 = vsyncmov [#allocation3 + $0xf] }
 0x2a2   :  { %s645_s21 = vpop.sfrf %644 }
 0x2a3   :  { %p784_p8 = scmp.ne.s32.totalorder %s645_s21, 0 }
 0x2a5   :  { %649 = shalt.err (%p784_p8)  }

</bundles_post_ra>
